<compile_context>
chip_gen: v7x
topology: tpu7x:2x2x1
jax: 0.10.0
libtpu: 0.0.40
codegen_flags: <defaults>
</compile_context>

<pallas_src>
import functools

import numpy as np
import jax
import jax.numpy as jnp
from jax.experimental import pallas as pl
from jax.experimental.pallas import tpu as pltpu

BN_EPS = 1e-5
_TILE_M = 512   # rows per M tile (measured knee of HBM roofline)

CFG = {
    'MODEL': {
        'EXTRA': {
            'STAGE2': {'NUM_MODULES': 1, 'NUM_BRANCHES': 2, 'BLOCK': 'BASIC',
                       'NUM_BLOCKS': [4, 4], 'NUM_CHANNELS': [48, 96],
                       'FUSE_METHOD': 'SUM'},
            'STAGE3': {'NUM_MODULES': 4, 'NUM_BRANCHES': 3, 'BLOCK': 'BASIC',
                       'NUM_BLOCKS': [4, 4, 4], 'NUM_CHANNELS': [48, 96, 192],
                       'FUSE_METHOD': 'SUM'},
            'STAGE4': {'NUM_MODULES': 3, 'NUM_BRANCHES': 4, 'BLOCK': 'BASIC',
                       'NUM_BLOCKS': [4, 4, 4, 4],
                       'NUM_CHANNELS': [48, 96, 192, 384],
                       'FUSE_METHOD': 'SUM'},
            'FINAL_CONV_KERNEL': 1,
        },
        'NUM_JOINTS': 17,
    }
}


# ----------------------------------------------------------------------------
# Compiler params (VMEM budget derived from the actual chip generation)
# ----------------------------------------------------------------------------

def _make_compiler_params(semantics):
    limit = None
    try:
        cap = int(pltpu.get_tpu_info().vmem_capacity_bytes)
        # <=48 MiB on v7x (64 MiB physical), ~96 MiB on v5e/v6e (128 MiB).
        limit = min((cap * 3) // 4, 96 * 1024 * 1024)
    except Exception:
        limit = None   # fall back to compiler default scoped-VMEM limit
    return pltpu.CompilerParams(dimension_semantics=semantics,
                                vmem_limit_bytes=limit)


_CP_PAR = _make_compiler_params(("parallel",))


# ----------------------------------------------------------------------------
# Pallas kernels: fused matmul (conv-as-im2col) + bias (+residual) (+relu)
# Fully streamed: every tile is independent -> "parallel" M grid axis.
# ----------------------------------------------------------------------------

def _matmul_bias_kernel(p_ref, w_ref, b_ref, o_ref, *, relu):
    y = jnp.dot(p_ref[...], w_ref[...], preferred_element_type=jnp.float32)
    y = y + b_ref[...]
    if relu:
        y = jnp.maximum(y, 0.0)
    o_ref[...] = y.astype(o_ref.dtype)


def _matmul_bias_res_kernel(p_ref, w_ref, b_ref, r_ref, o_ref, *, relu):
    y = jnp.dot(p_ref[...], w_ref[...], preferred_element_type=jnp.float32)
    y = y + b_ref[...] + r_ref[...].astype(jnp.float32)
    if relu:
        y = jnp.maximum(y, 0.0)
    o_ref[...] = y.astype(o_ref.dtype)


def _pallas_matmul_bias(p, wp, b2, resp, relu, tile_m, out_dtype):
    Mp, K = p.shape
    Cp = wp.shape[1]
    n_t = Mp // tile_m

    in_specs = [
        pl.BlockSpec((tile_m, K), lambda t: (t, 0)),   # patches: tiled over M
        pl.BlockSpec((K, Cp), lambda t: (0, 0)),       # folded weights
        pl.BlockSpec((1, Cp), lambda t: (0, 0)),       # folded bias
    ]
    args = [p, wp, b2]
    if resp is not None:
        in_specs.append(pl.BlockSpec((tile_m, Cp), lambda t: (t, 0)))  # residual (bf16, streamed)
        args.append(resp)
        kern = functools.partial(_matmul_bias_res_kernel, relu=relu)
    else:
        kern = functools.partial(_matmul_bias_kernel, relu=relu)

    return pl.pallas_call(
        kern,
        out_shape=jax.ShapeDtypeStruct((Mp, Cp), out_dtype),
        grid=(n_t,),
        in_specs=in_specs,
        out_specs=pl.BlockSpec((tile_m, Cp), lambda t: (t, 0)),  # streamed output
        compiler_params=_CP_PAR,
    )(*args)


# ----------------------------------------------------------------------------
# Conv wrappers (im2col / padding glue in plain JAX, hot path in Pallas)
# ----------------------------------------------------------------------------

def _round_up(x, m):
    return (x + m - 1) // m * m


def _im2col(x, kh, kw, stride, pad):
    # x: (N, H, W, C) bf16 -> patches (N*OH*OW, kh*kw*C), ordered (kh, kw, C)
    N, H, W, C = x.shape
    if pad:
        x = jnp.pad(x, ((0, 0), (pad, pad), (pad, pad), (0, 0)))
    Hp, Wp = H + 2 * pad, W + 2 * pad
    OH = (Hp - kh) // stride + 1
    OW = (Wp - kw) // stride + 1
    cols = []
    for i in range(kh):
        for j in range(kw):
            cols.append(x[:, i:i + (OH - 1) * stride + 1:stride,
                          j:j + (OW - 1) * stride + 1:stride, :])
    patches = jnp.concatenate(cols, axis=-1)
    return patches.reshape(N * OH * OW, kh * kw * C), (N, OH, OW)


def _prep_patches(x, kh, kw, stride):
    pad = (kh - 1) // 2
    xb = x.astype(jnp.bfloat16)     # no-op when activations are already bf16
    if kh == 1 and kw == 1 and stride == 1:
        N, H, W, C = x.shape
        return xb.reshape(N * H * W, C), (N, H, W)
    # TODO(synk): replace HBM im2col with an in-kernel halo conv for 3x3.
    return _im2col(xb, kh, kw, stride, pad)


def _tiles(M, cout):
    tile_m = _TILE_M if M > _TILE_M else _round_up(max(M, 8), 8)
    Mp = _round_up(M, tile_m)
    Cp = _round_up(cout, 128)       # lane-dense output stores
    return tile_m, Mp, Cp


@functools.partial(jax.jit, static_argnames=("stride", "relu", "out_dtype"))
def _conv_impl(x, w, b, *, stride, relu, out_dtype):
    kh, kw, cin, cout = w.shape
    p, (N, OH, OW) = _prep_patches(x, kh, kw, stride)
    M, K = p.shape
    tile_m, Mp, Cp = _tiles(M, cout)
    if Mp > M:
        p = jnp.pad(p, ((0, Mp - M), (0, 0)))
    wp = jnp.pad(w.reshape(K, cout),
                 ((0, 0), (0, Cp - cout))).astype(jnp.bfloat16)
    b2 = jnp.pad(b, (0, Cp - cout)).reshape(1, Cp).astype(jnp.float32)
    y = _pallas_matmul_bias(p, wp, b2, None, relu, tile_m, out_dtype)
    return y[:M, :cout].reshape(N, OH, OW, cout)


@functools.partial(jax.jit, static_argnames=("stride", "relu", "out_dtype"))
def _conv_res_impl(x, w, b, res, *, stride, relu, out_dtype):
    kh, kw, cin, cout = w.shape
    p, (N, OH, OW) = _prep_patches(x, kh, kw, stride)
    M, K = p.shape
    tile_m, Mp, Cp = _tiles(M, cout)
    if Mp > M:
        p = jnp.pad(p, ((0, Mp - M), (0, 0)))
    wp = jnp.pad(w.reshape(K, cout),
                 ((0, 0), (0, Cp - cout))).astype(jnp.bfloat16)
    b2 = jnp.pad(b, (0, Cp - cout)).reshape(1, Cp).astype(jnp.float32)
    # Residual streamed at its stored dtype (bf16); cast to f32 in-kernel.
    resp = jnp.pad(res.reshape(M, cout), ((0, Mp - M), (0, Cp - cout)))
    y = _pallas_matmul_bias(p, wp, b2, resp, relu, tile_m, out_dtype)
    return y[:M, :cout].reshape(N, OH, OW, cout)


def conv_block(x, params, stride=1, relu=True, residual=None,
               out_dtype=jnp.bfloat16):
    """Conv2d with BN pre-folded into (w, b), optional residual, optional ReLU."""
    w, b = params
    if residual is None:
        return _conv_impl(x, w, b, stride=stride, relu=relu, out_dtype=out_dtype)
    return _conv_res_impl(x, w, b, residual, stride=stride, relu=relu,
                          out_dtype=out_dtype)


def _upsample_nearest(x, scale):
    # TODO(synk): could be folded into the consumer add via a Pallas kernel.
    return jnp.repeat(jnp.repeat(x, scale, axis=1), scale, axis=2)


# ----------------------------------------------------------------------------
# Deterministic parameter construction (BN folded at build time, eval-mode)
# ----------------------------------------------------------------------------

class ParamGen:
    def __init__(self, seed=0):
        self.rng = np.random.default_rng(seed)

    def conv(self, kh, kw, cin, cout, std=0.05):
        w = self.rng.standard_normal((kh, kw, cin, cout)).astype(np.float32) * std
        return jnp.asarray(w)

    def conv_bn(self, kh, kw, cin, cout):
        # Conv weight + BatchNorm (gamma, beta, running_mean, running_var),
        # folded into an equivalent conv weight + bias (inference semantics).
        w = self.rng.standard_normal((kh, kw, cin, cout)).astype(np.float32) * 0.05
        g = self.rng.uniform(0.8, 1.2, cout).astype(np.float32)
        b = self.rng.uniform(-0.1, 0.1, cout).astype(np.float32)
        mean = self.rng.uniform(-0.05, 0.05, cout).astype(np.float32)
        var = self.rng.uniform(0.5, 1.5, cout).astype(np.float32)
        scale = g / np.sqrt(var + BN_EPS)
        wf = (w * scale).astype(np.float32)
        bf = (b - mean * scale).astype(np.float32)
        return (jnp.asarray(wf), jnp.asarray(bf))


def make_basic_block_params(pg, inplanes, planes, stride=1):
    p = {'stride': stride,
         'conv1': pg.conv_bn(3, 3, inplanes, planes),
         'conv2': pg.conv_bn(3, 3, planes, planes)}
    p['downsample'] = (pg.conv_bn(1, 1, inplanes, planes)
                       if (stride != 1 or inplanes != planes) else None)
    return p


def make_bottleneck_params(pg, inplanes, planes, stride=1):
    exp = 4
    p = {'stride': stride,
         'conv1': pg.conv_bn(1, 1, inplanes, planes),
         'conv2': pg.conv_bn(3, 3, planes, planes),
         'conv3': pg.conv_bn(1, 1, planes, planes * exp)}
    p['downsample'] = (pg.conv_bn(1, 1, inplanes, planes * exp)
                       if (stride != 1 or inplanes != planes * exp) else None)
    return p


def make_transition_params(pg, pre_channels, cur_channels):
    nb_pre, nb_cur = len(pre_channels), len(cur_channels)
    layers = []
    for i in range(nb_cur):
        if i < nb_pre:
            if cur_channels[i] != pre_channels[i]:
                layers.append(('conv', pg.conv_bn(3, 3, pre_channels[i], cur_channels[i])))
            else:
                layers.append(None)
        else:
            seq = []
            for j in range(i + 1 - nb_pre):
                inch = pre_channels[-1]
                outch = cur_channels[i] if j == i - nb_pre else inch
                seq.append(pg.conv_bn(3, 3, inch, outch))
            layers.append(('seq', seq))
    return layers


def make_hr_module_params(pg, num_branches, num_blocks, num_inchannels,
                          num_channels, multi_scale_output):
    # BASIC block, expansion = 1
    branches = []
    for i in range(num_branches):
        blocks = []
        inp = num_inchannels[i]
        for _ in range(num_blocks[i]):
            blocks.append(make_basic_block_params(pg, inp, num_channels[i], 1))
            inp = num_channels[i]
        branches.append(blocks)
    new_inch = [num_channels[i] for i in range(num_branches)]
    fuse = []
    for i in range(num_branches if multi_scale_output else 1):
        row = []
        for j in range(num_branches):
            if j > i:
                row.append(('up', pg.conv_bn(1, 1, new_inch[j], new_inch[i]),
                            2 ** (j - i)))
            elif j == i:
                row.append(None)
            else:
                convs = []
                for k in range(i - j):
                    last = (k == i - j - 1)
                    outc = new_inch[i] if last else new_inch[j]
                    convs.append((pg.conv_bn(3, 3, new_inch[j], outc), not last))
                row.append(('down', convs))
        fuse.append(row)
    return {'branches': branches, 'fuse': fuse,
            'num_branches': num_branches}, new_inch


def make_stage_params(pg, scfg, num_inchannels, multi_scale_output=True):
    mods = []
    inch = list(num_inchannels)
    nm = scfg['NUM_MODULES']
    for m in range(nm):
        mso = multi_scale_output or (m != nm - 1)
        mod, inch = make_hr_module_params(pg, scfg['NUM_BRANCHES'],
                                          scfg['NUM_BLOCKS'], inch,
                                          scfg['NUM_CHANNELS'], mso)
        mods.append(mod)
    return mods, inch


def build_pose_hrnet_params(seed=0):
    pg = ParamGen(seed)
    extra = CFG['MODEL']['EXTRA']
    P = {}
    P['conv1'] = pg.conv_bn(3, 3, 3, 64)
    P['conv2'] = pg.conv_bn(3, 3, 64, 64)
    # layer1: Bottleneck(64, planes=64) x 4
    layer1 = [make_bottleneck_params(pg, 64, 64, 1)]
    for _ in range(3):
        layer1.append(make_bottleneck_params(pg, 256, 64, 1))
    P['layer1'] = layer1

    s2 = extra['STAGE2']
    ch2 = [c * 1 for c in s2['NUM_CHANNELS']]       # BASIC expansion = 1
    P['transition1'] = make_transition_params(pg, [256], ch2)
    P['stage2'], pre = make_stage_params(pg, s2, ch2, True)

    s3 = extra['STAGE3']
    ch3 = [c * 1 for c in s3['NUM_CHANNELS']]
    P['transition2'] = make_transition_params(pg, pre, ch3)
    P['stage3'], pre = make_stage_params(pg, s3, ch3, True)

    s4 = extra['STAGE4']
    ch4 = [c * 1 for c in s4['NUM_CHANNELS']]
    P['transition3'] = make_transition_params(pg, pre, ch4)
    P['stage4'], pre = make_stage_params(pg, s4, ch4, False)

    k = extra['FINAL_CONV_KERNEL']                  # = 1 -> pad 0
    P['final_w'] = pg.conv(k, k, pre[0], CFG['MODEL']['NUM_JOINTS'])
    P['final_b'] = jnp.zeros((CFG['MODEL']['NUM_JOINTS'],), jnp.float32)
    return P


# ----------------------------------------------------------------------------
# Forward pass
# ----------------------------------------------------------------------------

def basic_block_fwd(p, x):
    residual = x
    out = conv_block(x, p['conv1'], stride=p['stride'], relu=True)
    if p['downsample'] is not None:
        residual = conv_block(x, p['downsample'], stride=p['stride'], relu=False)
    return conv_block(out, p['conv2'], stride=1, relu=True, residual=residual)


def bottleneck_fwd(p, x):
    residual = x
    out = conv_block(x, p['conv1'], stride=1, relu=True)
    out = conv_block(out, p['conv2'], stride=p['stride'], relu=True)
    if p['downsample'] is not None:
        residual = conv_block(x, p['downsample'], stride=p['stride'], relu=False)
    return conv_block(out, p['conv3'], stride=1, relu=True, residual=residual)


def transition_fwd(t, x):
    if t is None:
        return x
    kind, prm = t
    if kind == 'conv':
        return conv_block(x, prm, stride=1, relu=True)
    y = x
    for p in prm:
        y = conv_block(y, p, stride=2, relu=True)
    return y


def hr_module_fwd(p, xs):
    nb = p['num_branches']
    xs = list(xs)
    for i in range(nb):
        t = xs[i]
        for bp in p['branches'][i]:
            t = basic_block_fwd(bp, t)
        xs[i] = t
    outs = []
    for i, row in enumerate(p['fuse']):
        y = None
        for j in range(nb):
            if j == i:
                t = xs[j]
            else:
                entry = row[j]
                if entry[0] == 'up':
                    _, prm, scale = entry
                    t = _upsample_nearest(conv_block(xs[j], prm, stride=1,
                                                     relu=False), scale)
                else:
                    _, convs = entry
                    t = xs[j]
                    n = len(convs)
                    for k, (prm, rl) in enumerate(convs):
                        if k == n - 1 and y is not None:
                            # Fold the running fuse sum into the producing
                            # conv kernel as its in-kernel residual.
                            t = conv_block(t, prm, stride=2, relu=rl, residual=y)
                            y = None
                        else:
                            t = conv_block(t, prm, stride=2, relu=rl)
            y = t if y is None else y + t
        outs.append(jnp.maximum(y, 0.0))
    return outs


def pose_hrnet_forward(P, x_nchw):
    extra = CFG['MODEL']['EXTRA']
    x = jnp.transpose(x_nchw, (0, 2, 3, 1)).astype(jnp.float32)   # NCHW -> NHWC
    x = conv_block(x, P['conv1'], stride=2, relu=True)
    x = conv_block(x, P['conv2'], stride=2, relu=True)
    for bp in P['layer1']:
        x = bottleneck_fwd(bp, x)

    s2 = extra['STAGE2']
    x_list = []
    for i in range(s2['NUM_BRANCHES']):
        t = P['transition1'][i]
        x_list.append(transition_fwd(t, x) if t is not None else x)
    y_list = x_list
    for mod in P['stage2']:
        y_list = hr_module_fwd(mod, y_list)

    s3 = extra['STAGE3']
    x_list = []
    for i in range(s3['NUM_BRANCHES']):
        t = P['transition2'][i]
        x_list.append(transition_fwd(t, y_list[-1]) if t is not None else y_list[i])
    y_list = x_list
    for mod in P['stage3']:
        y_list = hr_module_fwd(mod, y_list)

    s4 = extra['STAGE4']
    x_list = []
    for i in range(s4['NUM_BRANCHES']):
        t = P['transition3'][i]
        x_list.append(transition_fwd(t, y_list[-1]) if t is not None else y_list[i])
    y_list = x_list
    for mod in P['stage4']:
        y_list = hr_module_fwd(mod, y_list)

    feature = y_list[0]                              # NHWC bf16 (N, H/4, W/4, 48)
    # Final 1x1 conv with bias (no BN): same fused streamed kernel, f32 out.
    kpt = conv_block(feature, (P['final_w'], P['final_b']), stride=1,
                     relu=False, out_dtype=jnp.float32)
    # back to PyTorch NCHW
    return (jnp.transpose(feature.astype(jnp.float32), (0, 3, 1, 2)),
            jnp.transpose(kpt, (0, 3, 1, 2)))


# ----------------------------------------------------------------------------

if __name__ == "__main__":
    params = build_pose_hrnet_params(seed=0)
    key = jax.random.PRNGKey(0)
    x = jax.random.normal(key, (2, 3, 32, 32), dtype=jnp.float32)   # NCHW input
    feature, kpt = pose_hrnet_forward(params, x)
    feature = jax.block_until_ready(feature)
    kpt = jax.block_until_ready(kpt)
    assert feature.shape == (2, 48, 8, 8), feature.shape
    assert kpt.shape == (2, 17, 8, 8), kpt.shape
    assert bool(jnp.isfinite(feature).all()) and bool(jnp.isfinite(kpt).all())
    print("KERNEL_OK")
</pallas_src>

<mosaic_0001>
module attributes {stable_mosaic.version = 11 : i64} {
  func.func @_matmul_bias_kernel(%arg0: i32, %arg1: memref<512x27xbf16, #tpu.memory_space<vmem>>, %arg2: memref<27x128xbf16, #tpu.memory_space<vmem>>, %arg3: memref<1x128xf32, #tpu.memory_space<vmem>>, %arg4: memref<512x128xbf16, #tpu.memory_space<vmem>>) attributes {dimension_semantics = [#tpu.dimension_semantics<parallel>], iteration_bounds = array<i64: 1>, scalar_prefetch = 0 : i64, scratch_operands = 0 : i64, tpu.core_type = #tpu.core_type<tc>, window_params = [{transform_indices = @transform_0, window_bounds = array<i64: 512, 27>}, {pipeline_mode = #tpu.pipeline_mode<synchronous>, transform_indices = @transform_1, window_bounds = array<i64: 27, 128>}, {pipeline_mode = #tpu.pipeline_mode<synchronous>, transform_indices = @transform_2, window_bounds = array<i64: 1, 128>}, {transform_indices = @transform_3, window_bounds = array<i64: 512, 128>}]} {
    %c0 = arith.constant 0 : index
    %c0_0 = arith.constant 0 : index
    %0 = vector.load %arg1[%c0, %c0_0] : memref<512x27xbf16, #tpu.memory_space<vmem>>, vector<512x27xbf16>
    %c0_1 = arith.constant 0 : index
    %c0_2 = arith.constant 0 : index
    %1 = vector.load %arg2[%c0_1, %c0_2] : memref<27x128xbf16, #tpu.memory_space<vmem>>, vector<27x128xbf16>
    %cst = arith.constant dense<0.000000e+00> : vector<512x128xf32>
    %2 = tpu.matmul %0, %1, %cst {dimension_numbers = #tpu.dot_dimension_numbers<[1], [0], [0], [1], [0, 0, 1, 1], [], []>} : vector<512x27xbf16>, vector<27x128xbf16>, vector<512x128xf32> -> vector<512x128xf32>
    %c0_3 = arith.constant 0 : index
    %c0_4 = arith.constant 0 : index
    %3 = vector.load %arg3[%c0_3, %c0_4] : memref<1x128xf32, #tpu.memory_space<vmem>>, vector<1x128xf32>
    %4 = vector.broadcast %3 : vector<1x128xf32> to vector<512x128xf32>
    %5 = arith.addf %2, %4 : vector<512x128xf32>
    %cst_5 = arith.constant 0.000000e+00 : f32
    %6 = vector.broadcast %cst_5 : f32 to vector<512x128xf32>
    %7 = arith.maximumf %5, %6 : vector<512x128xf32>
    %8 = arith.truncf %7 : vector<512x128xf32> to vector<512x128xbf16>
    %c0_6 = arith.constant 0 : index
    %c0_7 = arith.constant 0 : index
    %9 = vector.load %arg4[%c0_6, %c0_7] : memref<512x128xbf16, #tpu.memory_space<vmem>>, vector<512x128xbf16>
    tpu.vector_store %arg4[%c0_6, %c0_7], %8 {strides = array<i32>} : memref<512x128xbf16, #tpu.memory_space<vmem>>, vector<512x128xbf16>,
    return
  }
  func.func @transform_0(%arg0: i32) -> (i32, i32) {
    %c0_i32 = arith.constant 0 : i32
    %c0_i32_0 = arith.constant 0 : i32
    return %arg0, %c0_i32 : i32, i32
  }
  func.func @transform_1(%arg0: i32) -> (i32, i32) {
    %c0_i32 = arith.constant 0 : i32
    %c0_i32_0 = arith.constant 0 : i32
    %c0_i32_1 = arith.constant 0 : i32
    return %c0_i32, %c0_i32_0 : i32, i32
  }
  func.func @transform_2(%arg0: i32) -> (i32, i32) {
    %c0_i32 = arith.constant 0 : i32
    %c0_i32_0 = arith.constant 0 : i32
    %c0_i32_1 = arith.constant 0 : i32
    return %c0_i32, %c0_i32_0 : i32, i32
  }
  func.func @transform_3(%arg0: i32) -> (i32, i32) {
    %c0_i32 = arith.constant 0 : i32
    %c0_i32_0 = arith.constant 0 : i32
    return %arg0, %c0_i32 : i32, i32
  }
}

</mosaic_0001>

<bundles_post_ra>
// kernel: _conv_impl.1
= control target key start
LH: loop header
LB: loop body
LE: loop exit
PB: predicated region body
PF: predicated region fallthrough
CT: control target
= control target key end

     0   :  { %vm359_vm0 = vcmask 1044480   ;;  %vm360_vm1 = vcmask 1045504   ;;  %v1609_v2 = vmov 65535   ;;  %vm262_vm2 = vcmask 220160   ;;  %s1848_s0 = inlined_call_operand.vmem [shape: bf16[512,27], index: 0, kind: input, shape index: {}]   ;;  %s1849_s1 = inlined_call_operand.vmem [shape: bf16[27,128], index: 1, kind: input, shape index: {}]   ;;  %s1850_s2 = inlined_call_operand.vmem [shape: f32[1,128], index: 2, kind: input, shape index: {}]   ;;  %s1851_s3 = inlined_call_operand.hbm [shape: bf16[512,128], index: 3, kind: output, shape index: {}]  }
   0x1   :  { %v1551_v0 = vld [vmem:[%s1849_s1] sm:$0xff]   ;;  %v1552_v1 = vld [vmem:[%s1849_s1 + $0x8] sm:$0x3f]   ;;  %v361_v3 = vsel %vm359_vm0, 4294967295, %v1609_v2  ;;  %v1557_v10 = vld [vmem:[%s1848_s0 + $0x10] sm:$0xff]  }
   0x2   :  { %1475 = vmatprep.subr.bf16.mxu0 %v1551_v0  ;;  %1543 = vmatprep.subr.bf16.mxu1 %v1551_v0  ;;  %v1553_v4 = vld [vmem:[%s1848_s0] sm:$0xff]   ;;  %v362_v6 = vsel %vm360_vm1, %v361_v3, 0  ;;  %v1555_v8 = vld [vmem:[%s1848_s0 + $0x8] sm:$0xff]   ;;  %v1558_v11 = vld [vmem:[%s1848_s0 + $0x90] sm:$0xff]  }
   0x3   :  { %1476 = vmatpush3.bf16.msra.mxu0 %v1551_v0  ;;  %1545 = vmatpush3.bf16.msra.mxu1 %v1551_v0  ;;  %v1554_v5 = vld [vmem:[%s1848_s0 + $0x80] sm:$0xff]   ;;  %v364_v7 = vand.u32 %v1552_v1, %v362_v6  ;;  %v1556_v9 = vld [vmem:[%s1848_s0 + $0x88] sm:$0xff]   ;;  %v1559_v12 = vld [vmem:[%s1848_s0 + $0x18] sm:$0xff]  }
   0x4   :  { %1479 = vmatprep.mubr.msk.bf16.mxu0 %vm262_vm2, %v1553_v4  ;;  %1511 = vmatprep.mubr.msk.bf16.mxu1 %vm262_vm2, %v1554_v5  ;;  %v1560_v13 = vld [vmem:[%s1848_s0 + $0x98] sm:$0xff]   ;;  %v1561_v14 = vld [vmem:[%s1848_s0 + $0x20] sm:$0xff]   ;;  %v1563_v16 = vld [vmem:[%s1848_s0 + $0x28] sm:$0xff]  }
   0x5   :  { %1477 = vmatprep.subr.bf16.mxu0 %v364_v7  ;;  %1544 = vmatprep.subr.bf16.mxu1 %v364_v7  ;;  %v1562_v15 = vld [vmem:[%s1848_s0 + $0xa0] sm:$0xff]   ;;  %v1564_v17 = vld [vmem:[%s1848_s0 + $0xa8] sm:$0xff]   ;;  %v1565_v18 = vld [vmem:[%s1848_s0 + $0x30] sm:$0xff]  }
   0x6   :  { %v1566_v19 = vld [vmem:[%s1848_s0 + $0xb0] sm:$0xff]   ;;  %v1567_v20 = vld [vmem:[%s1848_s0 + $0x38] sm:$0xff]   ;;  %v1569_v22 = vld [vmem:[%s1848_s0 + $0x40] sm:$0xff]  }
   0x7   :  { %1478 = vmatpush3.bf16.msra.mxu0 %v364_v7  ;;  %1546 = vmatpush3.bf16.msra.mxu1 %v364_v7  ;;  %v1568_v21 = vld [vmem:[%s1848_s0 + $0xb8] sm:$0xff]   ;;  %v1570_v23 = vld [vmem:[%s1848_s0 + $0xc0] sm:$0xff]  }
   0xa   :  { %1480 = vmatmul.mubr.msk.bf16.vlgmr.msra.gmra.mrb[0].mxu0 %vm262_vm2, %v1555_v8  ;;  %1512 = vmatmul.mubr.msk.bf16.vlgmr.msra.gmra.mrb[0].mxu1 %vm262_vm2, %v1556_v9 }
   0xb   :  { %1483 = vmatprep.mubr.msk.bf16.mxu0 %vm262_vm2, %v1557_v10  ;;  %1515 = vmatprep.mubr.msk.bf16.mxu1 %vm262_vm2, %v1558_v11 }
  0x12   :  { %1484 = vmatmul.mubr.msk.bf16.gmra.mrb[4].mxu0 %vm262_vm2, %v1559_v12  ;;  %1516 = vmatmul.mubr.msk.bf16.gmra.mrb[4].mxu1 %vm262_vm2, %v1560_v13 }
  0x13   :  { %1487 = vmatprep.mubr.msk.bf16.mxu0 %vm262_vm2, %v1561_v14  ;;  %1519 = vmatprep.mubr.msk.bf16.mxu1 %vm262_vm2, %v1562_v15 }
  0x1a   :  { %1488 = vmatmul.mubr.msk.bf16.gmra.mrb[8].mxu0 %vm262_vm2, %v1563_v16  ;;  %1520 = vmatmul.mubr.msk.bf16.gmra.mrb[8].mxu1 %vm262_vm2, %v1564_v17 }
  0x1b   :  { %1491 = vmatprep.mubr.msk.bf16.mxu0 %vm262_vm2, %v1565_v18  ;;  %1523 = vmatprep.mubr.msk.bf16.mxu1 %vm262_vm2, %v1566_v19 }
  0x1c   :  { %8 = vsyncpa [#allocation3], 0  ;;  %v1571_v24 = vld [vmem:[%s1848_s0 + $0x48] sm:$0xff]   ;;  %v1573_v26 = vld [vmem:[%s1848_s0 + $0x50] sm:$0xff]  }
  0x1d   :  { %v1572_v25 = vld [vmem:[%s1848_s0 + $0xc8] sm:$0xff]   ;;  %v1574_v27 = vld [vmem:[%s1848_s0 + $0xd0] sm:$0xff]   ;;  %v1575_v28 = vld [vmem:[%s1848_s0 + $0x58] sm:$0xff]  }
  0x1e   :  { %v1576_v29 = vld [vmem:[%s1848_s0 + $0xd8] sm:$0xff]   ;;  %v1577_v30 = vld [vmem:[%s1848_s0 + $0x60] sm:$0xff]   ;;  %v1579_v32 = vld [vmem:[%s1848_s0 + $0x68] sm:$0xff]  }
  0x1f   :  { %v1578_v31 = vld [vmem:[%s1848_s0 + $0xe0] sm:$0xff]   ;;  %v1580_v33 = vld [vmem:[%s1848_s0 + $0xe8] sm:$0xff]   ;;  %v1581_v34 = vld [vmem:[%s1848_s0 + $0x70] sm:$0xff]  }
  0x20   :  { %v1582_v35 = vld [vmem:[%s1848_s0 + $0xf0] sm:$0xff]   ;;  %v1583_v36 = vld [vmem:[%s1848_s0 + $0x78] sm:$0xff]   ;;  %v1770_v38 = vld [vmem:[%s1850_s2] ss:$0 sm:$0xff] }
  0x21   :  { %v1584_v37 = vld [vmem:[%s1848_s0 + $0xf8] sm:$0xff]   ;;  %s1610_s0 = smov [#allocation2]  }
  0x22   :  { %1492 = vmatmul.mubr.msk.bf16.gmra.mrb[12].mxu0 %vm262_vm2, %v1567_v20  ;;  %1524 = vmatmul.mubr.msk.bf16.gmra.mrb[12].mxu1 %vm262_vm2, %v1568_v21  ;;  %s1044_s2 = sshll.u32 %s1610_s0, 4  ;;  %s1045_s2 = int_to_ptr.vmem [resolvable:$true] %s1044_s2 }
  0x23   :  { %1495 = vmatprep.mubr.msk.bf16.mxu0 %vm262_vm2, %v1569_v22  ;;  %1527 = vmatprep.mubr.msk.bf16.mxu1 %vm262_vm2, %v1570_v23  ;;  %s1585_s25 = scalar_lea.vmem %s1045_s2, 4096  ;;  %p1590_p1 = scmp.lt.s32.totalorder %s1045_s2, %s1045_s2 }
  0x24   :  { %p1586_p0 = scmp.ne.s32.totalorder %s1045_s2, %s1585_s25  ;;  %p1591_p2 = scmp.lt.s32.totalorder %s1585_s25, %s1585_s25 }
  0x26   :  { %p1592_p3 = por %p1591_p2, %p1590_p1 }
  0x28   :  { %p1593_p4 = pnand %p1592_p3, %p1586_p0 }
  0x2a   :  { %1496 = vmatmul.mubr.msk.bf16.gmra.mrb[16].mxu0 %vm262_vm2, %v1571_v24  ;;  %1528 = vmatmul.mubr.msk.bf16.gmra.mrb[16].mxu1 %vm262_vm2, %v1572_v25 }
  0x2b   :  { %1499 = vmatprep.mubr.msk.bf16.mxu0 %vm262_vm2, %v1573_v26  ;;  %1531 = vmatprep.mubr.msk.bf16.mxu1 %vm262_vm2, %v1574_v27 }
  0x32   :  { %1500 = vmatmul.mubr.msk.bf16.gmra.mrb[20].mxu0 %vm262_vm2, %v1575_v28  ;;  %1532 = vmatmul.mubr.msk.bf16.gmra.mrb[20].mxu1 %vm262_vm2, %v1576_v29 }
  0x33   :  { %1503 = vmatprep.mubr.msk.bf16.mxu0 %vm262_vm2, %v1577_v30  ;;  %1535 = vmatprep.mubr.msk.bf16.mxu1 %vm262_vm2, %v1578_v31 }
  0x3a   :  { %1504 = vmatmul.mubr.msk.bf16.gmra.mrb[24].mxu0 %vm262_vm2, %v1579_v32  ;;  %1536 = vmatmul.mubr.msk.bf16.gmra.mrb[24].mxu1 %vm262_vm2, %v1580_v33 }
  0x3b   :  { %1507 = vmatprep.mubr.msk.bf16.mxu0 %vm262_vm2, %v1581_v34  ;;  %1539 = vmatprep.mubr.msk.bf16.mxu1 %vm262_vm2, %v1582_v35 }
  0x42   :  { %1508 = vmatmul.mubr.msk.bf16.gmra.mrb[28].mxu0 %vm262_vm2, %v1583_v36  ;;  %1540 = vmatmul.mubr.msk.bf16.gmra.mrb[28].mxu1 %vm262_vm2, %v1584_v37 }
  0xdd   :  { %v1481_v39 = vpop.f32.mrb[0].mxu0  ;;  %v1513_v40 = vpop.f32.mrb[0].mxu1 }
  0xde   :  { %v409_v41 = vadd.f32 %v1481_v39, %v1770_v38  ;;  %v537_v42 = vadd.f32 %v1513_v40, %v1770_v38  ;;  %v400_v43 = vpop.f32.mrb[1].mxu0  ;;  %v528_v44 = vpop.f32.mrb[1].mxu1 }
  0xdf   :  { %v401_v45 = vadd.f32 %v1770_v38, %v400_v43  ;;  %v529_v46 = vadd.f32 %v1770_v38, %v528_v44  ;;  %v1482_v47 = vpop.f32.mrb[2].mxu0  ;;  %v1514_v48 = vpop.f32.mrb[2].mxu1 }
  0xe0   :  { %v412_v49 = vadd.f32 %v1482_v47, %v1770_v38  ;;  %v540_v50 = vadd.f32 %v1514_v48, %v1770_v38  ;;  %v403_v51 = vpop.f32.mrb[3].mxu0  ;;  %v531_v52 = vpop.f32.mrb[3].mxu1  ;;  %v657_v55 = vmax.f32 %v409_v41, 0.0  ;;  %v689_v56 = vmax.f32 %v537_v42, 0.0 }
  0xe1   :  { %v404_v53 = vadd.f32 %v1770_v38, %v403_v51  ;;  %v532_v54 = vadd.f32 %v1770_v38, %v531_v52  ;;  %v655_v59 = vmax.f32 %v401_v45, 0.0  ;;  %v687_v60 = vmax.f32 %v529_v46, 0.0 }
  0xe2   :  { %v658_v57 = vmax.f32 %v412_v49, 0.0  ;;  %v690_v58 = vmax.f32 %v540_v50, 0.0 }
  0xe3   :  { %v656_v61 = vmax.f32 %v404_v53, 0.0  ;;  %v688_v62 = vmax.f32 %v532_v54, 0.0 }
  0xe4   :  { %v1258_v63 = vpack.c.bf16 %v658_v57, %v657_v55  ;;  %v1338_v0 = vpack.c.bf16 %v690_v58, %v689_v56 }
  0xe5   :  { %v1253_v1 = vpack.c.bf16 %v656_v61, %v655_v59  ;;  %v1333_v2 = vpack.c.bf16 %v688_v62, %v687_v60  ;;  %v1485_v3 = vpop.f32.mrb[4].mxu0  ;;  %v1517_v4 = vpop.f32.mrb[4].mxu1 }
  0xe6   :  { %1410 = vst [vmem:[#allocation2 + $0x8] sm:$0xff] %v1258_v63   ;;  %1426 = vst [vmem:[#allocation2 + $0x88] sm:$0xff] %v1338_v0   ;;  %v425_v5 = vadd.f32 %v1485_v3, %v1770_v38  ;;  %v553_v6 = vadd.f32 %v1517_v4, %v1770_v38  ;;  %v416_v7 = vpop.f32.mrb[5].mxu0  ;;  %v544_v8 = vpop.f32.mrb[5].mxu1 }
  0xe7   :  { %1254 = vst [vmem:[#allocation2] sm:$0xff] %v1253_v1   ;;  %1425 = vst [vmem:[#allocation2 + $0x80] sm:$0xff] %v1333_v2   ;;  %v417_v9 = vadd.f32 %v1770_v38, %v416_v7  ;;  %v545_v10 = vadd.f32 %v1770_v38, %v544_v8  ;;  %v1486_v11 = vpop.f32.mrb[6].mxu0  ;;  %v1518_v12 = vpop.f32.mrb[6].mxu1 }
  0xe8   :  { %v428_v13 = vadd.f32 %v1486_v11, %v1770_v38  ;;  %v556_v14 = vadd.f32 %v1518_v12, %v1770_v38  ;;  %v419_v15 = vpop.f32.mrb[7].mxu0  ;;  %v547_v16 = vpop.f32.mrb[7].mxu1  ;;  %v661_v19 = vmax.f32 %v425_v5, 0.0  ;;  %v693_v20 = vmax.f32 %v553_v6, 0.0 }
  0xe9   :  { %v420_v17 = vadd.f32 %v1770_v38, %v419_v15  ;;  %v548_v18 = vadd.f32 %v1770_v38, %v547_v16  ;;  %v659_v23 = vmax.f32 %v417_v9, 0.0  ;;  %v691_v24 = vmax.f32 %v545_v10, 0.0 }
  0xea   :  { %v662_v21 = vmax.f32 %v428_v13, 0.0  ;;  %v694_v22 = vmax.f32 %v556_v14, 0.0 }
  0xeb   :  { %v660_v25 = vmax.f32 %v420_v17, 0.0  ;;  %v692_v26 = vmax.f32 %v548_v18, 0.0 }
  0xec   :  { %v1268_v27 = vpack.c.bf16 %v662_v21, %v661_v19  ;;  %v1348_v28 = vpack.c.bf16 %v694_v22, %v693_v20 }
  0xed   :  { %v1263_v29 = vpack.c.bf16 %v660_v25, %v659_v23  ;;  %v1343_v30 = vpack.c.bf16 %v692_v26, %v691_v24  ;;  %v1489_v31 = vpop.f32.mrb[8].mxu0  ;;  %v1521_v32 = vpop.f32.mrb[8].mxu1 }
  0xee   :  { %1412 = vst [vmem:[#allocation2 + $0x18] sm:$0xff] %v1268_v27   ;;  %1428 = vst [vmem:[#allocation2 + $0x98] sm:$0xff] %v1348_v28   ;;  %v441_v33 = vadd.f32 %v1489_v31, %v1770_v38  ;;  %v569_v34 = vadd.f32 %v1521_v32, %v1770_v38  ;;  %v432_v35 = vpop.f32.mrb[9].mxu0  ;;  %v560_v36 = vpop.f32.mrb[9].mxu1 }
  0xef   :  { %1411 = vst [vmem:[#allocation2 + $0x10] sm:$0xff] %v1263_v29   ;;  %1427 = vst [vmem:[#allocation2 + $0x90] sm:$0xff] %v1343_v30   ;;  %v433_v37 = vadd.f32 %v1770_v38, %v432_v35  ;;  %v561_v39 = vadd.f32 %v1770_v38, %v560_v36  ;;  %v1490_v40 = vpop.f32.mrb[10].mxu0  ;;  %v1522_v41 = vpop.f32.mrb[10].mxu1 }
  0xf0   :  { %v444_v42 = vadd.f32 %v1490_v40, %v1770_v38  ;;  %v572_v43 = vadd.f32 %v1522_v41, %v1770_v38  ;;  %v435_v44 = vpop.f32.mrb[11].mxu0  ;;  %v563_v45 = vpop.f32.mrb[11].mxu1  ;;  %v665_v48 = vmax.f32 %v441_v33, 0.0  ;;  %v697_v49 = vmax.f32 %v569_v34, 0.0 }
  0xf1   :  { %v436_v46 = vadd.f32 %v1770_v38, %v435_v44  ;;  %v564_v47 = vadd.f32 %v1770_v38, %v563_v45  ;;  %v663_v52 = vmax.f32 %v433_v37, 0.0  ;;  %v695_v53 = vmax.f32 %v561_v39, 0.0 }
  0xf2   :  { %v666_v50 = vmax.f32 %v444_v42, 0.0  ;;  %v698_v51 = vmax.f32 %v572_v43, 0.0 }
  0xf3   :  { %v664_v54 = vmax.f32 %v436_v46, 0.0  ;;  %v696_v55 = vmax.f32 %v564_v47, 0.0 }
  0xf4   :  { %v1278_v56 = vpack.c.bf16 %v666_v50, %v665_v48  ;;  %v1358_v57 = vpack.c.bf16 %v698_v51, %v697_v49 }
  0xf5   :  { %v1273_v58 = vpack.c.bf16 %v664_v54, %v663_v52  ;;  %v1353_v59 = vpack.c.bf16 %v696_v55, %v695_v53  ;;  %v1493_v60 = vpop.f32.mrb[12].mxu0  ;;  %v1525_v61 = vpop.f32.mrb[12].mxu1 }
  0xf6   :  { %1414 = vst [vmem:[#allocation2 + $0x28] sm:$0xff] %v1278_v56   ;;  %1430 = vst [vmem:[#allocation2 + $0xa8] sm:$0xff] %v1358_v57   ;;  %v457_v62 = vadd.f32 %v1493_v60, %v1770_v38  ;;  %v585_v63 = vadd.f32 %v1525_v61, %v1770_v38  ;;  %v448_v0 = vpop.f32.mrb[13].mxu0  ;;  %v576_v1 = vpop.f32.mrb[13].mxu1 }
  0xf7   :  { %1413 = vst [vmem:[#allocation2 + $0x20] sm:$0xff] %v1273_v58   ;;  %1429 = vst [vmem:[#allocation2 + $0xa0] sm:$0xff] %v1353_v59   ;;  %v449_v2 = vadd.f32 %v1770_v38, %v448_v0  ;;  %v577_v3 = vadd.f32 %v1770_v38, %v576_v1  ;;  %v1494_v4 = vpop.f32.mrb[14].mxu0  ;;  %v1526_v5 = vpop.f32.mrb[14].mxu1 }
  0xf8   :  { %v460_v6 = vadd.f32 %v1494_v4, %v1770_v38  ;;  %v588_v7 = vadd.f32 %v1526_v5, %v1770_v38  ;;  %v451_v8 = vpop.f32.mrb[15].mxu0  ;;  %v579_v9 = vpop.f32.mrb[15].mxu1  ;;  %v669_v12 = vmax.f32 %v457_v62, 0.0  ;;  %v701_v13 = vmax.f32 %v585_v63, 0.0 }
  0xf9   :  { %v452_v10 = vadd.f32 %v1770_v38, %v451_v8  ;;  %v580_v11 = vadd.f32 %v1770_v38, %v579_v9  ;;  %v667_v16 = vmax.f32 %v449_v2, 0.0  ;;  %v699_v17 = vmax.f32 %v577_v3, 0.0 }
  0xfa   :  { %v670_v14 = vmax.f32 %v460_v6, 0.0  ;;  %v702_v15 = vmax.f32 %v588_v7, 0.0 }
  0xfb   :  { %v668_v18 = vmax.f32 %v452_v10, 0.0  ;;  %v700_v19 = vmax.f32 %v580_v11, 0.0 }
  0xfc   :  { %v1288_v20 = vpack.c.bf16 %v670_v14, %v669_v12  ;;  %v1368_v21 = vpack.c.bf16 %v702_v15, %v701_v13 }
  0xfd   :  { %v1283_v22 = vpack.c.bf16 %v668_v18, %v667_v16  ;;  %v1363_v23 = vpack.c.bf16 %v700_v19, %v699_v17  ;;  %v1497_v24 = vpop.f32.mrb[16].mxu0  ;;  %v1529_v25 = vpop.f32.mrb[16].mxu1 }
  0xfe   :  { %1416 = vst [vmem:[#allocation2 + $0x38] sm:$0xff] %v1288_v20   ;;  %1432 = vst [vmem:[#allocation2 + $0xb8] sm:$0xff] %v1368_v21   ;;  %v473_v26 = vadd.f32 %v1497_v24, %v1770_v38  ;;  %v601_v27 = vadd.f32 %v1529_v25, %v1770_v38  ;;  %v464_v28 = vpop.f32.mrb[17].mxu0  ;;  %v592_v29 = vpop.f32.mrb[17].mxu1 }
  0xff   :  { %1415 = vst [vmem:[#allocation2 + $0x30] sm:$0xff] %v1283_v22   ;;  %1431 = vst [vmem:[#allocation2 + $0xb0] sm:$0xff] %v1363_v23   ;;  %v465_v30 = vadd.f32 %v1770_v38, %v464_v28  ;;  %v593_v31 = vadd.f32 %v1770_v38, %v592_v29  ;;  %v1498_v32 = vpop.f32.mrb[18].mxu0  ;;  %v1530_v33 = vpop.f32.mrb[18].mxu1 }
 0x100   :  { %v476_v34 = vadd.f32 %v1498_v32, %v1770_v38  ;;  %v604_v35 = vadd.f32 %v1530_v33, %v1770_v38  ;;  %v467_v36 = vpop.f32.mrb[19].mxu0  ;;  %v595_v37 = vpop.f32.mrb[19].mxu1  ;;  %v673_v41 = vmax.f32 %v473_v26, 0.0  ;;  %v705_v42 = vmax.f32 %v601_v27, 0.0 }
 0x101   :  { %v468_v39 = vadd.f32 %v1770_v38, %v467_v36  ;;  %v596_v40 = vadd.f32 %v1770_v38, %v595_v37  ;;  %v671_v45 = vmax.f32 %v465_v30, 0.0  ;;  %v703_v46 = vmax.f32 %v593_v31, 0.0 }
 0x102   :  { %v674_v43 = vmax.f32 %v476_v34, 0.0  ;;  %v706_v44 = vmax.f32 %v604_v35, 0.0 }
 0x103   :  { %v672_v47 = vmax.f32 %v468_v39, 0.0  ;;  %v704_v48 = vmax.f32 %v596_v40, 0.0 }
 0x104   :  { %v1298_v49 = vpack.c.bf16 %v674_v43, %v673_v41  ;;  %v1378_v50 = vpack.c.bf16 %v706_v44, %v705_v42 }
 0x105   :  { %v1293_v51 = vpack.c.bf16 %v672_v47, %v671_v45  ;;  %v1373_v52 = vpack.c.bf16 %v704_v48, %v703_v46  ;;  %v1501_v53 = vpop.f32.mrb[20].mxu0  ;;  %v1533_v54 = vpop.f32.mrb[20].mxu1 }
 0x106   :  { %1418 = vst [vmem:[#allocation2 + $0x48] sm:$0xff] %v1298_v49   ;;  %1434 = vst [vmem:[#allocation2 + $0xc8] sm:$0xff] %v1378_v50   ;;  %v489_v55 = vadd.f32 %v1501_v53, %v1770_v38  ;;  %v617_v56 = vadd.f32 %v1533_v54, %v1770_v38  ;;  %v480_v57 = vpop.f32.mrb[21].mxu0  ;;  %v608_v58 = vpop.f32.mrb[21].mxu1 }
 0x107   :  { %1417 = vst [vmem:[#allocation2 + $0x40] sm:$0xff] %v1293_v51   ;;  %1433 = vst [vmem:[#allocation2 + $0xc0] sm:$0xff] %v1373_v52   ;;  %v481_v59 = vadd.f32 %v1770_v38, %v480_v57  ;;  %v609_v60 = vadd.f32 %v1770_v38, %v608_v58  ;;  %v1502_v61 = vpop.f32.mrb[22].mxu0  ;;  %v1534_v62 = vpop.f32.mrb[22].mxu1 }
 0x108   :  { %v492_v63 = vadd.f32 %v1502_v61, %v1770_v38  ;;  %v620_v0 = vadd.f32 %v1534_v62, %v1770_v38  ;;  %v483_v1 = vpop.f32.mrb[23].mxu0  ;;  %v611_v2 = vpop.f32.mrb[23].mxu1  ;;  %v677_v5 = vmax.f32 %v489_v55, 0.0  ;;  %v709_v6 = vmax.f32 %v617_v56, 0.0 }
 0x109   :  { %v484_v3 = vadd.f32 %v1770_v38, %v483_v1  ;;  %v612_v4 = vadd.f32 %v1770_v38, %v611_v2  ;;  %v675_v9 = vmax.f32 %v481_v59, 0.0  ;;  %v707_v10 = vmax.f32 %v609_v60, 0.0 }
 0x10a   :  { %v678_v7 = vmax.f32 %v492_v63, 0.0  ;;  %v710_v8 = vmax.f32 %v620_v0, 0.0 }
 0x10b   :  { %v676_v11 = vmax.f32 %v484_v3, 0.0  ;;  %v708_v12 = vmax.f32 %v612_v4, 0.0 }
 0x10c   :  { %v1308_v13 = vpack.c.bf16 %v678_v7, %v677_v5  ;;  %v1388_v14 = vpack.c.bf16 %v710_v8, %v709_v6 }
 0x10d   :  { %v1303_v15 = vpack.c.bf16 %v676_v11, %v675_v9  ;;  %v1383_v16 = vpack.c.bf16 %v708_v12, %v707_v10  ;;  %v1505_v17 = vpop.f32.mrb[24].mxu0  ;;  %v1537_v18 = vpop.f32.mrb[24].mxu1 }
 0x10e   :  { %1420 = vst [vmem:[#allocation2 + $0x58] sm:$0xff] %v1308_v13   ;;  %1436 = vst [vmem:[#allocation2 + $0xd8] sm:$0xff] %v1388_v14   ;;  %v505_v19 = vadd.f32 %v1505_v17, %v1770_v38  ;;  %v633_v20 = vadd.f32 %v1537_v18, %v1770_v38  ;;  %v496_v21 = vpop.f32.mrb[25].mxu0  ;;  %v624_v22 = vpop.f32.mrb[25].mxu1 }
 0x10f   :  { %1419 = vst [vmem:[#allocation2 + $0x50] sm:$0xff] %v1303_v15   ;;  %1435 = vst [vmem:[#allocation2 + $0xd0] sm:$0xff] %v1383_v16   ;;  %v497_v23 = vadd.f32 %v1770_v38, %v496_v21  ;;  %v625_v24 = vadd.f32 %v1770_v38, %v624_v22  ;;  %v1506_v25 = vpop.f32.mrb[26].mxu0  ;;  %v1538_v26 = vpop.f32.mrb[26].mxu1 }
 0x110   :  { %v508_v27 = vadd.f32 %v1506_v25, %v1770_v38  ;;  %v636_v28 = vadd.f32 %v1538_v26, %v1770_v38  ;;  %v499_v29 = vpop.f32.mrb[27].mxu0  ;;  %v627_v30 = vpop.f32.mrb[27].mxu1  ;;  %v681_v33 = vmax.f32 %v505_v19, 0.0  ;;  %v713_v34 = vmax.f32 %v633_v20, 0.0 }
 0x111   :  { %v500_v31 = vadd.f32 %v1770_v38, %v499_v29  ;;  %v628_v32 = vadd.f32 %v1770_v38, %v627_v30  ;;  %v679_v37 = vmax.f32 %v497_v23, 0.0  ;;  %v711_v39 = vmax.f32 %v625_v24, 0.0 }
 0x112   :  { %v682_v35 = vmax.f32 %v508_v27, 0.0  ;;  %v714_v36 = vmax.f32 %v636_v28, 0.0 }
 0x113   :  { %v680_v40 = vmax.f32 %v500_v31, 0.0  ;;  %v712_v41 = vmax.f32 %v628_v32, 0.0 }
 0x114   :  { %v1318_v42 = vpack.c.bf16 %v682_v35, %v681_v33  ;;  %v1398_v43 = vpack.c.bf16 %v714_v36, %v713_v34 }
 0x115   :  { %v1313_v44 = vpack.c.bf16 %v680_v40, %v679_v37  ;;  %v1393_v45 = vpack.c.bf16 %v712_v41, %v711_v39  ;;  %v1509_v46 = vpop.f32.mrb[28].mxu0  ;;  %v1541_v47 = vpop.f32.mrb[28].mxu1 }
 0x116   :  { %1422 = vst [vmem:[#allocation2 + $0x68] sm:$0xff] %v1318_v42   ;;  %1438 = vst [vmem:[#allocation2 + $0xe8] sm:$0xff] %v1398_v43   ;;  %v521_v48 = vadd.f32 %v1509_v46, %v1770_v38  ;;  %v649_v49 = vadd.f32 %v1541_v47, %v1770_v38  ;;  %v512_v50 = vpop.f32.mrb[29].mxu0  ;;  %v640_v51 = vpop.f32.mrb[29].mxu1 }
 0x117   :  { %1421 = vst [vmem:[#allocation2 + $0x60] sm:$0xff] %v1313_v44   ;;  %1437 = vst [vmem:[#allocation2 + $0xe0] sm:$0xff] %v1393_v45   ;;  %v513_v52 = vadd.f32 %v1770_v38, %v512_v50  ;;  %v641_v53 = vadd.f32 %v1770_v38, %v640_v51  ;;  %v1510_v54 = vpop.f32.mrb[30].mxu0  ;;  %v1542_v55 = vpop.f32.mrb[30].mxu1 }
 0x118   :  { %v524_v56 = vadd.f32 %v1510_v54, %v1770_v38  ;;  %v652_v57 = vadd.f32 %v1542_v55, %v1770_v38  ;;  %v515_v58 = vpop.f32.mrb[31].mxu0  ;;  %v643_v59 = vpop.f32.mrb[31].mxu1  ;;  %v685_v62 = vmax.f32 %v521_v48, 0.0  ;;  %v717_v63 = vmax.f32 %v649_v49, 0.0 }
 0x119   :  { %v516_v60 = vadd.f32 %v1770_v38, %v515_v58  ;;  %v644_v61 = vadd.f32 %v1770_v38, %v643_v59  ;;  %v683_v2 = vmax.f32 %v513_v52, 0.0  ;;  %v715_v3 = vmax.f32 %v641_v53, 0.0 }
 0x11a   :  { %v686_v0 = vmax.f32 %v524_v56, 0.0  ;;  %v718_v1 = vmax.f32 %v652_v57, 0.0 }
 0x11b   :  { %v684_v4 = vmax.f32 %v516_v60, 0.0  ;;  %v716_v5 = vmax.f32 %v644_v61, 0.0 }
 0x11c   :  { %v1328_v6 = vpack.c.bf16 %v686_v0, %v685_v62  ;;  %v1408_v7 = vpack.c.bf16 %v718_v1, %v717_v63 }
 0x11d   :  { %v1323_v8 = vpack.c.bf16 %v684_v4, %v683_v2  ;;  %v1403_v9 = vpack.c.bf16 %v716_v5, %v715_v3 }
 0x11e   :  { %1424 = vst [vmem:[#allocation2 + $0x78] sm:$0xff] %v1328_v6   ;;  %1440 = vst [vmem:[#allocation2 + $0xf8] sm:$0xff] %v1408_v7  }
 0x11f   :  { %1423 = vst [vmem:[#allocation2 + $0x70] sm:$0xff] %v1323_v8   ;;  %1439 = vst [vmem:[#allocation2 + $0xf0] sm:$0xff] %v1403_v9  }
 0x120   :  { %1596 = shalt.err (!%p1593_p4)
}
 0x121   :  { %s1597_s28 = scalar_lea.hbm %s1851_s3, 4096 }
 0x122   :  { %p1598_p5 = scmp.ne.s32.totalorder %s1851_s3, %s1597_s28  ;;  %p1601_p6 = scmp.lt.u32.totalorder %s1597_s28, %s1851_s3 }
 0x124   :  { %p1603_p7 = pnand %p1601_p6, %p1598_p5 }
 0x126   :  { %1606 = shalt.err (!%p1603_p7)
}
 0x127   :  { %s1611_s6 = smov 64   ;;  %s1612_s7 = smov 4  }
 0x128   :  { %1050 = dma.vmem_to_hbm [thread:$0]  %s1045_s2, 4096, %s1851_s3, [#allocation3], %s1611_s6, %s1611_s6, %s1612_s7  }
 0x129   :  { %1607 = dma.done.wait [#allocation3], 4096  }
 0x12a   :  { %1608 = vsyncadd [#allocation3], 4294963200 }
 0x12b   :  { %1054 = vsyncpa [#allocation3], 1 }

</bundles_post_ra>
